<compile_context>
chip_gen: v6e
topology: v6e:2x2x1
jax: 0.10.0
libtpu: 0.0.40
codegen_flags: <defaults>
</compile_context>

<pallas_src>
import numpy as np
import jax
import jax.numpy as jnp
from jax.experimental import pallas as pl
from jax.experimental.pallas import tpu as pltpu


def _round_up(x, mult):
    return ((x + mult - 1) // mult) * mult


# ---------------------------------------------------------------------------
# Operator precomputation (numpy glue) — faithful to torch_harmonics
# ---------------------------------------------------------------------------
def clenshaw_curtiss_weights(n):
    """Clenshaw-Curtiss quadrature weights on [-1, 1] for nodes cos(j*pi/(n-1))."""
    N = n - 1
    w = np.zeros(n, dtype=np.float64)
    for j in range(n):
        s = 0.0
        for k in range(1, N // 2 + 1):
            b = 1.0 if 2 * k == N else 2.0
            s += b / (4.0 * k * k - 1.0) * np.cos(2.0 * k * j * np.pi / N)
        c = 1.0 if (j == 0 or j == N) else 2.0
        w[j] = (c / N) * (1.0 - s)
    return w


def legpoly(mmax, lmax, x, csphase=True):
    """Ortho-normalized associated Legendre polynomials P̄_l^m(x), shape (mmax, lmax, len(x))."""
    nmax = max(mmax, lmax)
    vdm = np.zeros((nmax, nmax, len(x)), dtype=np.float64)
    vdm[0, 0, :] = 1.0 / np.sqrt(4.0 * np.pi)
    for l in range(1, nmax):
        vdm[l - 1, l, :] = np.sqrt(2 * l + 1) * x * vdm[l - 1, l - 1, :]
        vdm[l, l, :] = np.sqrt((2 * l + 1) * (1 + x) * (1 - x) / (2 * l)) * vdm[l - 1, l - 1, :]
    for l in range(2, nmax):
        for m in range(0, l - 1):
            a = np.sqrt((2 * l - 1) / (l - m) * (2 * l + 1) / (l + m))
            b = np.sqrt((l + m - 1) / (l - m) * (2 * l + 1) / (2 * l - 3) * (l - m - 1) / (l + m))
            vdm[m, l, :] = x * a * vdm[m, l - 1, :] - b * vdm[m, l - 2, :]
    vdm = vdm[:mmax, :lmax]
    if csphase:
        vdm[1::2] *= -1.0
    return vdm


def build_operators(nlat, nlon, modes1, modes2):
    """Fused, zero-padded forward/inverse SHT operators (all layout work hoisted into numpy).

    Forward operator columns / inverse operator rows are ordered [Re-block | Im-block], each block
    indexed f = l' * m2p + m with l' in [0, m1p) = low-l region and l' in [m1p, 2*m1p) = high-l
    region; padded (l', m) positions are zero columns/rows.
    """
    lmax, mmax = nlat, nlon // 2 + 1
    assert modes1 <= lmax and modes2 <= mmax
    m1p, m2p = _round_up(modes1, 8), _round_up(modes2, 8)
    L = 2 * m1p

    t = np.arange(nlat) * np.pi / (nlat - 1)          # equiangular colatitudes in [0, pi]
    ct = np.cos(t)
    w = clenshaw_curtiss_weights(nlat)                # quadrature weights over cos(theta)
    pct = legpoly(mmax, lmax, ct)                     # (mmax, lmax, nlat)
    wleg = pct * w[None, None, :]                     # quadrature folded in

    # longitude DFT factors; retained modes only (zero beyond modes2), matching
    # 2*pi * rfft(norm="forward") and irfft(norm="forward") with DC/Nyquist imag discarded.
    phi = np.arange(nlon)
    m_idx = np.arange(m2p)
    ang = 2.0 * np.pi * np.outer(m_idx, phi) / nlon                       # (m2p, nlon)
    valid = (m_idx < modes2).astype(np.float64)[:, None]
    fcos = (2.0 * np.pi / nlon) * np.cos(ang) * valid
    fsin = -(2.0 * np.pi / nlon) * np.sin(ang) * valid
    s = np.where((m_idx == 0) | ((nlon % 2 == 0) & (m_idx == nlon // 2)), 1.0, 2.0)
    icos = s[:, None] * np.cos(ang) * valid
    isin = -s[:, None] * np.sin(ang) * valid

    # forward Legendre x quadrature, both retained l-regions stacked along l'
    wl3 = np.zeros((L, m2p, nlat))
    wl3[:modes1, :modes2] = np.transpose(wleg[:modes2, :modes1, :], (1, 0, 2))
    wl3[m1p:m1p + modes1, :modes2] = np.transpose(wleg[:modes2, lmax - modes1:, :], (1, 0, 2))

    # inverse Legendre; weights2 region overwrites any l-overlap with region 1 (torch semantics),
    # so zero the overlapping l' rows of region 1.
    p1 = pct[:modes2, :modes1, :].copy()
    ov = max(lmax - modes1, 0)
    if ov < modes1:
        p1[:, ov:, :] = 0.0
    pct_sel = np.zeros((L, m2p, nlat))
    pct_sel[:modes1, :modes2] = np.transpose(p1, (1, 0, 2))
    pct_sel[m1p:m1p + modes1, :modes2] = np.transpose(pct[:modes2, lmax - modes1:, :], (1, 0, 2))

    # fused forward operator: rows (t, phi), cols [Re | Im] x (l', m)
    fwd_re = np.einsum('lmt,mp->tplm', wl3, fcos).reshape(nlat * nlon, L * m2p)
    fwd_im = np.einsum('lmt,mp->tplm', wl3, fsin).reshape(nlat * nlon, L * m2p)
    fwd_op = np.concatenate([fwd_re, fwd_im], axis=1)                      # (nlat*nlon, 2*LM)

    # fused inverse operator: rows [Re | Im] x (l', m), cols (t, phi)
    inv_re = np.einsum('lmt,mp->lmtp', pct_sel, icos).reshape(L * m2p, nlat * nlon)
    inv_im = np.einsum('lmt,mp->lmtp', pct_sel, isin).reshape(L * m2p, nlat * nlon)
    inv_op = np.concatenate([inv_re, inv_im], axis=0)                      # (2*LM, nlat*nlon)

    # bf16 operators (f32 accumulation in-kernel): native MXU path, half the DMA/VMEM bytes.
    consts = dict(fwd=jnp.asarray(fwd_op, dtype=jnp.bfloat16),
                  inv=jnp.asarray(inv_op, dtype=jnp.bfloat16))
    ref_ops = dict(pct=jnp.asarray(pct, dtype=jnp.float32),
                   quad_w=jnp.asarray(w, dtype=jnp.float32))
    return consts, ref_ops


# ---------------------------------------------------------------------------
# Pallas kernel: fused forward SHT -> VPU channel mix -> fused inverse SHT
# ---------------------------------------------------------------------------
def spherical_conv_kernel(x_ref, fwd_ref, wr_ref, wi_ref, inv_ref, y_ref):
    f32 = jnp.float32
    cout, cin, lm = wr_ref.shape                       # lm = 2*m1p*m2p (flattened (l', m))
    bblk = x_ref.shape[0] // cin                       # samples in this block

    # (1) fused forward SHT (longitude DFT x Legendre/quadrature): ONE bf16 MXU matmul,
    #     K = nlat*nlon, N = 2*LM (both 256 here), f32 accumulation.
    S = jnp.dot(x_ref[...], fwd_ref[...], preferred_element_type=f32)      # (bblk*cin, 2*LM)

    # (2) complex channel mix on the VPU: Cin is tiny, so a K=Cin broadcast-multiply + sublane
    #     reduce beats per-mode M=1 MXU GEMVs.  Lanes hold the full 128-wide (l', m) index.
    sr = S[:, :lm].reshape(bblk, 1, cin, lm)                               # Re(x_ht)
    si = S[:, lm:].reshape(bblk, 1, cin, lm)                               # Im(x_ht)
    wr = wr_ref[...]                                                       # (cout, cin, lm) f32
    wi = wi_ref[...]
    mix_r = jnp.sum(sr * wr - si * wi, axis=2).reshape(bblk * cout, lm)
    mix_i = jnp.sum(sr * wi + si * wr, axis=2).reshape(bblk * cout, lm)
    o_spec = jnp.concatenate([mix_r, mix_i], axis=1).astype(inv_ref.dtype)  # (bblk*cout, 2*LM)

    # (3) fused inverse SHT (inverse Legendre x inverse DFT): ONE bf16 MXU matmul,
    #     lane-dense (nlat*nlon-wide) unmasked store.
    y_ref[...] = jnp.dot(o_spec, inv_ref[...],
                         preferred_element_type=f32).astype(y_ref.dtype)


@jax.jit
def spherical_conv(x, w1r, w1i, w2r, w2i, fwd_op, inv_op):
    B, Cin, nlat, nlon = x.shape
    Cout = w1r.shape[1]
    m1, m2 = w1r.shape[2], w1r.shape[3]
    m1p, m2p = _round_up(m1, 8), _round_up(m2, 8)
    LM = 2 * m1p * m2p
    assert fwd_op.shape == (nlat * nlon, 2 * LM)
    assert inv_op.shape == (2 * LM, nlat * nlon)

    # Channel-mix weights laid out (Cout, Cin, (l', m)) so the kernel broadcasts them on the VPU.
    # Region 1 (l in [0, m1)) -> l' in [0, m1p); region 2 (l in [lmax-m1, lmax)) -> l' in
    # [m1p, 2*m1p); padded positions are zero (matching the zero columns of fwd_op).
    def place(wgt):                                      # (Cin, Cout, m1, m2) -> (Cout, Cin, m1p, m2p)
        wgt = jnp.transpose(wgt, (1, 0, 2, 3))
        return jnp.pad(wgt, ((0, 0), (0, 0), (0, m1p - m1), (0, m2p - m2)))

    wr_mix = jnp.concatenate([place(w1r), place(w2r)], axis=2).reshape(Cout, Cin, LM)
    wi_mix = jnp.concatenate([place(w1i), place(w2i)], axis=2).reshape(Cout, Cin, LM)

    # NCHW flatten is a free reshape (no transpose); bf16 activations for the MXU fast path.
    x2 = x.reshape(B * Cin, nlat * nlon).astype(jnp.bfloat16)

    # All samples in one grid step: matmul M = B*Cin, all matmul N dims and the output store are
    # >= 256 lanes (unmasked vst).  On v7x with larger B, use bblk = B // 2 so the "parallel"
    # batch axis splits across both TensorCores while keeping lane-dense blocks.
    bblk = B
    n_blk = pl.cdiv(B, bblk)

    flops = (2 * (B * Cin) * (nlat * nlon) * (2 * LM)        # fused forward SHT matmul
             + 8 * B * Cout * Cin * LM                       # VPU channel mix
             + 2 * (B * Cout) * (2 * LM) * (nlat * nlon))    # fused inverse SHT matmul
    bytes_accessed = (x2.size * 2 + fwd_op.size * 2 + inv_op.size * 2
                      + (wr_mix.size + wi_mix.size) * 4
                      + B * Cout * nlat * nlon * 4)

    y2 = pl.pallas_call(
        spherical_conv_kernel,
        out_shape=jax.ShapeDtypeStruct((B * Cout, nlat * nlon), jnp.float32),
        grid=(n_blk,),
        in_specs=[
            pl.BlockSpec((bblk * Cin, nlat * nlon), lambda b: (b, 0)),
            # Grid-invariant operators / mix weights (constant index maps -> fetched once).
            # TODO(synk): at real SFNO sizes single-buffer these (pipeline_mode=pl.Buffered(1))
            # and stream per-mode operator blocks; negligible (~0.5 MiB total) at toy shapes.
            pl.BlockSpec(fwd_op.shape, lambda b: (0, 0)),
            pl.BlockSpec(wr_mix.shape, lambda b: (0, 0, 0)),
            pl.BlockSpec(wi_mix.shape, lambda b: (0, 0, 0)),
            pl.BlockSpec(inv_op.shape, lambda b: (0, 0)),
        ],
        out_specs=pl.BlockSpec((bblk * Cout, nlat * nlon), lambda b: (b, 0)),
        compiler_params=pltpu.CompilerParams(dimension_semantics=("parallel",)),
        cost_estimate=pl.CostEstimate(flops=flops, transcendentals=0,
                                      bytes_accessed=bytes_accessed),
    )(x2, fwd_op, wr_mix, wi_mix, inv_op)

    # Flat rows are (b, o), flat cols are (t, phi): a free reshape back to NCHW.
    return y2.reshape(B, Cout, nlat, nlon)


# ---------------------------------------------------------------------------
# Pure-JAX reference (mirrors the PyTorch / torch_harmonics forward pass)
# ---------------------------------------------------------------------------
def spherical_conv_reference(x, w1, w2, pct, quad_w, modes1, modes2):
    B, Cin, nlat, nlon = x.shape
    lmax, mmax = nlat, nlon // 2 + 1
    cout = w1.shape[1]
    weights = (pct * quad_w[None, None, :]).astype(jnp.complex64)
    xf = 2.0 * jnp.pi * jnp.fft.rfft(x, axis=-1, norm="forward")          # (B,Cin,nlat,mmax)
    x_ht = jnp.einsum('bctm,mlt->bclm', xf, weights)                      # RealSHT
    out_ht = jnp.zeros((B, cout, lmax, mmax), dtype=jnp.complex64)
    r1 = jnp.einsum('bixy,ioxy->boxy', x_ht[:, :, :modes1, :modes2], w1)
    r2 = jnp.einsum('bixy,ioxy->boxy', x_ht[:, :, lmax - modes1:, :modes2], w2)
    out_ht = out_ht.at[:, :, :modes1, :modes2].set(r1)
    out_ht = out_ht.at[:, :, lmax - modes1:, :modes2].set(r2)
    g = jnp.einsum('bolm,mlt->botm', out_ht, pct.astype(jnp.complex64))   # InverseRealSHT
    return jnp.fft.irfft(g, n=nlon, axis=-1, norm="forward")


# ---------------------------------------------------------------------------
# Main
# ---------------------------------------------------------------------------
if __name__ == "__main__":
    B, Cin, Cout = 2, 4, 4
    nlat, nlon = 16, 16
    modes1, modes2 = 6, 6
    scale = 1.0 / (Cin * Cout)

    key = jax.random.PRNGKey(0)
    kx, k1r, k1i, k2r, k2i = jax.random.split(key, 5)
    x = jax.random.normal(kx, (B, Cin, nlat, nlon), dtype=jnp.float32)
    wshape = (Cin, Cout, modes1, modes2)
    # torch.rand(..., dtype=cfloat): real & imag parts i.i.d. uniform[0,1), scaled.
    w1r = scale * jax.random.uniform(k1r, wshape, dtype=jnp.float32)
    w1i = scale * jax.random.uniform(k1i, wshape, dtype=jnp.float32)
    w2r = scale * jax.random.uniform(k2r, wshape, dtype=jnp.float32)
    w2i = scale * jax.random.uniform(k2i, wshape, dtype=jnp.float32)

    consts, ref_ops = build_operators(nlat, nlon, modes1, modes2)

    y = spherical_conv(x, w1r, w1i, w2r, w2i, consts['fwd'], consts['inv'])
    y = jax.block_until_ready(y)

    w1 = (w1r + 1j * w1i).astype(jnp.complex64)
    w2 = (w2r + 1j * w2i).astype(jnp.complex64)
    y_ref = spherical_conv_reference(x, w1, w2, ref_ops['pct'], ref_ops['quad_w'],
                                     modes1, modes2)
    # bf16 operators/activations with f32 accumulation: validate at the ~2e-2 tolerance.
    np.testing.assert_allclose(np.asarray(y), np.asarray(y_ref), rtol=2e-2, atol=2e-2)
    print("KERNEL_OK")
</pallas_src>

<mosaic_0001>
module attributes {stable_mosaic.version = 11 : i64} {
  func.func @spherical_conv_kernel(%arg0: i32, %arg1: memref<8x256xbf16, #tpu.memory_space<vmem>>, %arg2: memref<256x256xbf16, #tpu.memory_space<vmem>>, %arg3: memref<4x4x128xf32, #tpu.memory_space<vmem>>, %arg4: memref<4x4x128xf32, #tpu.memory_space<vmem>>, %arg5: memref<256x256xbf16, #tpu.memory_space<vmem>>, %arg6: memref<8x256xf32, #tpu.memory_space<vmem>>) attributes {dimension_semantics = [#tpu.dimension_semantics<parallel>], iteration_bounds = array<i64: 1>, scalar_prefetch = 0 : i64, scratch_operands = 0 : i64, tpu.core_type = #tpu.core_type<tc>, window_params = [{transform_indices = @transform_0, window_bounds = array<i64: 8, 256>}, {pipeline_mode = #tpu.pipeline_mode<synchronous>, transform_indices = @transform_1, window_bounds = array<i64: 256, 256>}, {pipeline_mode = #tpu.pipeline_mode<synchronous>, transform_indices = @transform_2, window_bounds = array<i64: 4, 4, 128>}, {pipeline_mode = #tpu.pipeline_mode<synchronous>, transform_indices = @transform_3, window_bounds = array<i64: 4, 4, 128>}, {pipeline_mode = #tpu.pipeline_mode<synchronous>, transform_indices = @transform_4, window_bounds = array<i64: 256, 256>}, {transform_indices = @transform_5, window_bounds = array<i64: 8, 256>}]} {
    %c0 = arith.constant 0 : index
    %c0_0 = arith.constant 0 : index
    %0 = vector.load %arg1[%c0, %c0_0] : memref<8x256xbf16, #tpu.memory_space<vmem>>, vector<8x256xbf16>
    %c0_1 = arith.constant 0 : index
    %c0_2 = arith.constant 0 : index
    %1 = vector.load %arg2[%c0_1, %c0_2] : memref<256x256xbf16, #tpu.memory_space<vmem>>, vector<256x256xbf16>
    %cst = arith.constant dense<0.000000e+00> : vector<8x256xf32>
    %2 = tpu.matmul %0, %1, %cst {dimension_numbers = #tpu.dot_dimension_numbers<[1], [0], [0], [1], [0, 0, 1, 1], [], []>} : vector<8x256xbf16>, vector<256x256xbf16>, vector<8x256xf32> -> vector<8x256xf32>
    %3 = vector.extract_strided_slice %2 {offsets = [0, 0], sizes = [8, 128], strides = [1, 1]} : vector<8x256xf32> to vector<8x128xf32>
    %4 = vector.shape_cast %3 : vector<8x128xf32> to vector<2x1x4x128xf32>
    %5 = vector.extract_strided_slice %2 {offsets = [0, 128], sizes = [8, 128], strides = [1, 1]} : vector<8x256xf32> to vector<8x128xf32>
    %6 = vector.shape_cast %5 : vector<8x128xf32> to vector<2x1x4x128xf32>
    %c0_3 = arith.constant 0 : index
    %c0_4 = arith.constant 0 : index
    %c0_5 = arith.constant 0 : index
    %7 = vector.load %arg3[%c0_3, %c0_4, %c0_5] : memref<4x4x128xf32, #tpu.memory_space<vmem>>, vector<4x4x128xf32>
    %c0_6 = arith.constant 0 : index
    %c0_7 = arith.constant 0 : index
    %c0_8 = arith.constant 0 : index
    %8 = vector.load %arg4[%c0_6, %c0_7, %c0_8] : memref<4x4x128xf32, #tpu.memory_space<vmem>>, vector<4x4x128xf32>
    %9 = vector.shape_cast %7 : vector<4x4x128xf32> to vector<1x4x4x128xf32>
    %10 = vector.broadcast %4 : vector<2x1x4x128xf32> to vector<2x4x4x128xf32>
    %11 = vector.broadcast %9 : vector<1x4x4x128xf32> to vector<2x4x4x128xf32>
    %12 = arith.mulf %10, %11 : vector<2x4x4x128xf32>
    %13 = vector.shape_cast %8 : vector<4x4x128xf32> to vector<1x4x4x128xf32>
    %14 = vector.broadcast %6 : vector<2x1x4x128xf32> to vector<2x4x4x128xf32>
    %15 = vector.broadcast %13 : vector<1x4x4x128xf32> to vector<2x4x4x128xf32>
    %16 = arith.mulf %14, %15 : vector<2x4x4x128xf32>
    %17 = arith.subf %12, %16 : vector<2x4x4x128xf32>
    %cst_9 = arith.constant dense<0.000000e+00> : vector<2x4x128xf32>
    %18 = vector.multi_reduction <add>, %17, %cst_9 [2] : vector<2x4x4x128xf32> to vector<2x4x128xf32>
    %19 = vector.shape_cast %18 : vector<2x4x128xf32> to vector<8x128xf32>
    %20 = vector.shape_cast %8 : vector<4x4x128xf32> to vector<1x4x4x128xf32>
    %21 = vector.broadcast %4 : vector<2x1x4x128xf32> to vector<2x4x4x128xf32>
    %22 = vector.broadcast %20 : vector<1x4x4x128xf32> to vector<2x4x4x128xf32>
    %23 = arith.mulf %21, %22 : vector<2x4x4x128xf32>
    %24 = vector.shape_cast %7 : vector<4x4x128xf32> to vector<1x4x4x128xf32>
    %25 = vector.broadcast %6 : vector<2x1x4x128xf32> to vector<2x4x4x128xf32>
    %26 = vector.broadcast %24 : vector<1x4x4x128xf32> to vector<2x4x4x128xf32>
    %27 = arith.mulf %25, %26 : vector<2x4x4x128xf32>
    %28 = arith.addf %23, %27 : vector<2x4x4x128xf32>
    %cst_10 = arith.constant dense<0.000000e+00> : vector<2x4x128xf32>
    %29 = vector.multi_reduction <add>, %28, %cst_10 [2] : vector<2x4x4x128xf32> to vector<2x4x128xf32>
    %30 = vector.shape_cast %29 : vector<2x4x128xf32> to vector<8x128xf32>
    %31 = tpu.concatenate %19, %30 in 1 : vector<8x128xf32>, vector<8x128xf32> -> vector<8x256xf32>
    %32 = arith.truncf %31 : vector<8x256xf32> to vector<8x256xbf16>
    %c0_11 = arith.constant 0 : index
    %c0_12 = arith.constant 0 : index
    %33 = vector.load %arg5[%c0_11, %c0_12] : memref<256x256xbf16, #tpu.memory_space<vmem>>, vector<256x256xbf16>
    %cst_13 = arith.constant dense<0.000000e+00> : vector<8x256xf32>
    %34 = tpu.matmul %32, %33, %cst_13 {dimension_numbers = #tpu.dot_dimension_numbers<[1], [0], [0], [1], [0, 0, 1, 1], [], []>} : vector<8x256xbf16>, vector<256x256xbf16>, vector<8x256xf32> -> vector<8x256xf32>
    %c0_14 = arith.constant 0 : index
    %c0_15 = arith.constant 0 : index
    %35 = vector.load %arg6[%c0_14, %c0_15] : memref<8x256xf32, #tpu.memory_space<vmem>>, vector<8x256xf32>
    tpu.vector_store %arg6[%c0_14, %c0_15], %34 {strides = array<i32>} : memref<8x256xf32, #tpu.memory_space<vmem>>, vector<8x256xf32>,
    return
  }
  func.func @transform_0(%arg0: i32) -> (i32, i32) {
    %c0_i32 = arith.constant 0 : i32
    %c0_i32_0 = arith.constant 0 : i32
    return %arg0, %c0_i32 : i32, i32
  }
  func.func @transform_1(%arg0: i32) -> (i32, i32) {
    %c0_i32 = arith.constant 0 : i32
    %c0_i32_0 = arith.constant 0 : i32
    %c0_i32_1 = arith.constant 0 : i32
    return %c0_i32, %c0_i32_0 : i32, i32
  }
  func.func @transform_2(%arg0: i32) -> (i32, i32, i32) {
    %c0_i32 = arith.constant 0 : i32
    %c0_i32_0 = arith.constant 0 : i32
    %c0_i32_1 = arith.constant 0 : i32
    %c0_i32_2 = arith.constant 0 : i32
    return %c0_i32, %c0_i32_0, %c0_i32_1 : i32, i32, i32
  }
  func.func @transform_3(%arg0: i32) -> (i32, i32, i32) {
    %c0_i32 = arith.constant 0 : i32
    %c0_i32_0 = arith.constant 0 : i32
    %c0_i32_1 = arith.constant 0 : i32
    %c0_i32_2 = arith.constant 0 : i32
    return %c0_i32, %c0_i32_0, %c0_i32_1 : i32, i32, i32
  }
  func.func @transform_4(%arg0: i32) -> (i32, i32) {
    %c0_i32 = arith.constant 0 : i32
    %c0_i32_0 = arith.constant 0 : i32
    %c0_i32_1 = arith.constant 0 : i32
    return %c0_i32, %c0_i32_0 : i32, i32
  }
  func.func @transform_5(%arg0: i32) -> (i32, i32) {
    %c0_i32 = arith.constant 0 : i32
    %c0_i32_0 = arith.constant 0 : i32
    return %arg0, %c0_i32 : i32, i32
  }
}

</mosaic_0001>

<bundles_post_ra>
// kernel: spherical_conv.1
= control target key start
LH: loop header
LB: loop body
LE: loop exit
PB: predicated region body
PF: predicated region fallthrough
CT: control target
= control target key end

     0   :  { %vm299_vm0 = vcmask 1043456   ;;  %vm444_vm1 = vcmask 1041409   ;;  %vm446_vm2 = vcmask 1042434   ;;  %vm448_vm3 = vcmask 1043459   ;;  %s1272_s1 = inlined_call_operand.vmem [shape: bf16[256,256], index: 1, kind: input, shape index: {}]   ;;  %s1273_s0 = inlined_call_operand.vmem [shape: bf16[8,256], index: 0, kind: input, shape index: {}]   ;;  %s1274_s4 = inlined_call_operand.vmem [shape: bf16[256,256], index: 4, kind: input, shape index: {}]   ;;  %s1275_s2 = inlined_call_operand.vmem [shape: f32[4,4,128], index: 2, kind: input, shape index: {}]   ;;  %s1276_s3 = inlined_call_operand.vmem [shape: f32[4,4,128], index: 3, kind: input, shape index: {}]   ;;  %s1277_s5 = inlined_call_operand.vmem [shape: f32[8,256], index: 5, kind: output, shape index: {}]  }
   0x1   :  { %v782_v0 = vld [vmem:[%s1272_s1 + $0x74] ss:$8 sps:$4 sm:$0xff]   ;;  %v784_v1 = vld [vmem:[%s1272_s1 + $0x70] ss:$8 sps:$4 sm:$0xff]   ;;  %v785_v2 = vld [vmem:[%s1272_s1 + $0x64] ss:$8 sps:$4 sm:$0xff]  }
   0x2   :  { %220 = vmatprep.subr.bf16.mxu0 %v782_v0  ;;  %v787_v3 = vld [vmem:[%s1272_s1 + $0x60] ss:$8 sps:$4 sm:$0xff]   ;;  %v788_v4 = vld [vmem:[%s1272_s1 + $0x54] ss:$8 sps:$4 sm:$0xff]   ;;  %v790_v5 = vld [vmem:[%s1272_s1 + $0x50] ss:$8 sps:$4 sm:$0xff]  }
   0x3   :  { %221 = vmatpush1.bf16.msra.mxu0 %v784_v1  ;;  %v791_v6 = vld [vmem:[%s1272_s1 + $0x44] ss:$8 sps:$4 sm:$0xff]   ;;  %v793_v7 = vld [vmem:[%s1272_s1 + $0x40] ss:$8 sps:$4 sm:$0xff]   ;;  %v794_v8 = vld [vmem:[%s1272_s1 + $0x34] ss:$8 sps:$4 sm:$0xff]  }
   0x4   :  { %222 = vmatprep.subr.bf16.mxu0 %v785_v2  ;;  %v796_v9 = vld [vmem:[%s1272_s1 + $0x30] ss:$8 sps:$4 sm:$0xff]   ;;  %v797_v10 = vld [vmem:[%s1272_s1 + $0x24] ss:$8 sps:$4 sm:$0xff]   ;;  %v799_v11 = vld [vmem:[%s1272_s1 + $0x20] ss:$8 sps:$4 sm:$0xff]  }
   0x5   :  { %v800_v12 = vld [vmem:[%s1272_s1 + $0x14] ss:$8 sps:$4 sm:$0xff]   ;;  %v802_v13 = vld [vmem:[%s1272_s1 + $0x10] ss:$8 sps:$4 sm:$0xff]   ;;  %v955_v14 = vld [vmem:[%s1273_s0] sm:$0xff]  ;;  %vm450_vm4 = vcmask 1044484  }
   0x6   :  { %v717_v15 = vcombine.high %v955_v14, %v955_v14  ;;  %v832_v16 = vld [vmem:[%s1274_s4 + $0x74] ss:$8 sps:$4 sm:$0xff]   ;;  %v834_v17 = vld [vmem:[%s1274_s4 + $0x70] ss:$8 sps:$4 sm:$0xff]   ;;  %v835_v18 = vld [vmem:[%s1274_s4 + $0x64] ss:$8 sps:$4 sm:$0xff]   ;;  %v716_v52 = vcombine.low %v955_v14, %v955_v14 }
   0x7   :  { %223 = vmatpush1.bf16.msra.mxu0 %v787_v3  ;;  %v803_v19 = vld [vmem:[%s1272_s1 + $0x4] ss:$8 sps:$4 sm:$0xff]   ;;  %669 = vmatprep.subr.bf16.mxu1 %v832_v16  ;;  %v805_v20 = vld [vmem:[%s1272_s1] ss:$8 sps:$4 sm:$0xff]   ;;  %v838_v22 = vld [vmem:[%s1274_s4 + $0x54] ss:$8 sps:$4 sm:$0xff]  }
   0x8   :  { %224 = vmatprep.subr.bf16.mxu0 %v788_v4  ;;  %252 = vmatprep.mubr.bf16.mxu0 %v717_v15  ;;  %v837_v21 = vld [vmem:[%s1274_s4 + $0x60] ss:$8 sps:$4 sm:$0xff]   ;;  %v806_v23 = vld [vmem:[%s1272_s1 + $0xf4] ss:$8 sps:$4 sm:$0xff]   ;;  %v808_v24 = vld [vmem:[%s1272_s1 + $0xf0] ss:$8 sps:$4 sm:$0xff]  }
   0x9   :  { %670 = vmatpush1.bf16.msra.mxu1 %v834_v17  ;;  %v840_v25 = vld [vmem:[%s1274_s4 + $0x50] ss:$8 sps:$4 sm:$0xff]   ;;  %v841_v26 = vld [vmem:[%s1274_s4 + $0x44] ss:$8 sps:$4 sm:$0xff]   ;;  %v811_v28 = vld [vmem:[%s1272_s1 + $0xe0] ss:$8 sps:$4 sm:$0xff]  }
   0xa   :  { %671 = vmatprep.subr.bf16.mxu1 %v835_v18  ;;  %v809_v27 = vld [vmem:[%s1272_s1 + $0xe4] ss:$8 sps:$4 sm:$0xff]   ;;  %v843_v29 = vld [vmem:[%s1274_s4 + $0x40] ss:$8 sps:$4 sm:$0xff]   ;;  %v844_v30 = vld [vmem:[%s1274_s4 + $0x34] ss:$8 sps:$4 sm:$0xff]  }
   0xb   :  { %225 = vmatpush1.bf16.msra.mxu0 %v790_v5  ;;  %v812_v31 = vld [vmem:[%s1272_s1 + $0xd4] ss:$8 sps:$4 sm:$0xff]   ;;  %v846_v32 = vld [vmem:[%s1274_s4 + $0x30] ss:$8 sps:$4 sm:$0xff]   ;;  %v847_v34 = vld [vmem:[%s1274_s4 + $0x24] ss:$8 sps:$4 sm:$0xff]  }
   0xc   :  { %226 = vmatprep.subr.bf16.mxu0 %v791_v6  ;;  %v814_v33 = vld [vmem:[%s1272_s1 + $0xd0] ss:$8 sps:$4 sm:$0xff]   ;;  %v815_v35 = vld [vmem:[%s1272_s1 + $0xc4] ss:$8 sps:$4 sm:$0xff]   ;;  %v849_v36 = vld [vmem:[%s1274_s4 + $0x20] ss:$8 sps:$4 sm:$0xff]  }
   0xd   :  { %672 = vmatpush1.bf16.msra.mxu1 %v837_v21  ;;  %v817_v37 = vld [vmem:[%s1272_s1 + $0xc0] ss:$8 sps:$4 sm:$0xff]   ;;  %v850_v38 = vld [vmem:[%s1274_s4 + $0x14] ss:$8 sps:$4 sm:$0xff]   ;;  %v852_v40 = vld [vmem:[%s1274_s4 + $0x10] ss:$8 sps:$4 sm:$0xff]  }
   0xe   :  { %673 = vmatprep.subr.bf16.mxu1 %v838_v22  ;;  %v818_v39 = vld [vmem:[%s1272_s1 + $0xb4] ss:$8 sps:$4 sm:$0xff]   ;;  %v820_v41 = vld [vmem:[%s1272_s1 + $0xb0] ss:$8 sps:$4 sm:$0xff]   ;;  %v853_v42 = vld [vmem:[%s1274_s4 + $0x4] ss:$8 sps:$4 sm:$0xff]  }
   0xf   :  { %227 = vmatpush1.bf16.msra.mxu0 %v793_v7  ;;  %v821_v43 = vld [vmem:[%s1272_s1 + $0xa4] ss:$8 sps:$4 sm:$0xff]   ;;  %v855_v44 = vld [vmem:[%s1274_s4] ss:$8 sps:$4 sm:$0xff]   ;;  %v856_v46 = vld [vmem:[%s1274_s4 + $0xf4] ss:$8 sps:$4 sm:$0xff]  }
  0x10   :  { %228 = vmatprep.subr.bf16.mxu0 %v794_v8  ;;  %v823_v45 = vld [vmem:[%s1272_s1 + $0xa0] ss:$8 sps:$4 sm:$0xff]   ;;  %v824_v47 = vld [vmem:[%s1272_s1 + $0x94] ss:$8 sps:$4 sm:$0xff]   ;;  %v858_v48 = vld [vmem:[%s1274_s4 + $0xf0] ss:$8 sps:$4 sm:$0xff]  }
  0x11   :  { %674 = vmatpush1.bf16.msra.mxu1 %v840_v25  ;;  %v826_v49 = vld [vmem:[%s1272_s1 + $0x90] ss:$8 sps:$4 sm:$0xff]   ;;  %v827_v50 = vld [vmem:[%s1272_s1 + $0x84] ss:$8 sps:$4 sm:$0xff]   ;;  %v829_v51 = vld [vmem:[%s1272_s1 + $0x80] ss:$8 sps:$4 sm:$0xff]  }
  0x12   :  { %675 = vmatprep.subr.bf16.mxu1 %v841_v26  ;;  %v859_v53 = vld [vmem:[%s1274_s4 + $0xe4] ss:$8 sps:$4 sm:$0xff]   ;;  %v861_v54 = vld [vmem:[%s1274_s4 + $0xe0] ss:$8 sps:$4 sm:$0xff]   ;;  %v862_v55 = vld [vmem:[%s1274_s4 + $0xd4] ss:$8 sps:$4 sm:$0xff]  }
  0x13   :  { %229 = vmatpush1.bf16.msra.mxu0 %v796_v9  ;;  %v864_v56 = vld [vmem:[%s1274_s4 + $0xd0] ss:$8 sps:$4 sm:$0xff]   ;;  %v865_v57 = vld [vmem:[%s1274_s4 + $0xc4] ss:$8 sps:$4 sm:$0xff]   ;;  %v867_v58 = vld [vmem:[%s1274_s4 + $0xc0] ss:$8 sps:$4 sm:$0xff]  }
  0x14   :  { %230 = vmatprep.subr.bf16.mxu0 %v797_v10  ;;  %v868_v59 = vld [vmem:[%s1274_s4 + $0xb4] ss:$8 sps:$4 sm:$0xff]   ;;  %v870_v60 = vld [vmem:[%s1274_s4 + $0xb0] ss:$8 sps:$4 sm:$0xff]   ;;  %v871_v61 = vld [vmem:[%s1274_s4 + $0xa4] ss:$8 sps:$4 sm:$0xff]  }
  0x15   :  { %676 = vmatpush1.bf16.msra.mxu1 %v843_v29  ;;  %v873_v62 = vld [vmem:[%s1274_s4 + $0xa0] ss:$8 sps:$4 sm:$0xff]   ;;  %v874_v63 = vld [vmem:[%s1274_s4 + $0x94] ss:$8 sps:$4 sm:$0xff]   ;;  %v876_v0 = vld [vmem:[%s1274_s4 + $0x90] ss:$8 sps:$4 sm:$0xff]  }
  0x16   :  { %677 = vmatprep.subr.bf16.mxu1 %v844_v30  ;;  %v877_v1 = vld [vmem:[%s1274_s4 + $0x84] ss:$8 sps:$4 sm:$0xff]   ;;  %v879_v2 = vld [vmem:[%s1274_s4 + $0x80] ss:$8 sps:$4 sm:$0xff]   ;;  %vm452_vm5 = vcmask 1045509   ;;  %vm454_vm6 = vcmask 1046534  }
  0x17   :  { %231 = vmatpush1.bf16.msra.mxu0 %v799_v11  ;;  %v1114_v3 = vld [vmem:[%s1275_s2] sm:$0xf]  ;;  %v1119_v4 = vld [vmem:[%s1275_s2 + $0x4] sm:$0xf]  ;;  %v1124_v5 = vld [vmem:[%s1275_s2 + $0x8] sm:$0xf] }
  0x18   :  { %232 = vmatprep.subr.bf16.mxu0 %v800_v12  ;;  %v1129_v6 = vld [vmem:[%s1275_s2 + $0xc] sm:$0xf]  ;;  %v1134_v7 = vld [vmem:[%s1276_s3] sm:$0xf]  ;;  %v1139_v8 = vld [vmem:[%s1276_s3 + $0x4] sm:$0xf] }
  0x19   :  { %678 = vmatpush1.bf16.msra.mxu1 %v846_v32  ;;  %v1144_v9 = vld [vmem:[%s1276_s3 + $0x8] sm:$0xf]  ;;  %v1151_v12 = vld [vmem:[%s1276_s3 + $0xc] sm:$0xf]  ;;  %vm456_vm7 = vcmask 1047559  }
  0x1a   :  { %679 = vmatprep.subr.bf16.mxu1 %v847_v34 }
  0x1b   :  { %233 = vmatpush1.bf16.msra.mxu0 %v802_v13 }
  0x1c   :  { %234 = vmatprep.subr.bf16.mxu0 %v803_v19 }
  0x1d   :  { %680 = vmatpush1.bf16.msra.mxu1 %v849_v36 }
  0x1e   :  { %681 = vmatprep.subr.bf16.mxu1 %v850_v38 }
  0x1f   :  { %235 = vmatpush1.bf16.msra.mxu0 %v805_v20 }
  0x20   :  { %236 = vmatprep.subr.bf16.mxu0 %v806_v23 }
  0x21   :  { %682 = vmatpush1.bf16.msra.mxu1 %v852_v40 }
  0x22   :  { %683 = vmatprep.subr.bf16.mxu1 %v853_v42 }
  0x23   :  { %237 = vmatpush2.bf16.msra.mxu0 %v808_v24 }
  0x24   :  { %238 = vmatprep.subr.bf16.mxu0 %v809_v27 }
  0x25   :  { %684 = vmatpush1.bf16.msra.mxu1 %v855_v44 }
  0x26   :  { %685 = vmatprep.subr.bf16.mxu1 %v856_v46 }
  0x27   :  { %239 = vmatpush2.bf16.msra.mxu0 %v811_v28 }
  0x28   :  { %240 = vmatprep.subr.bf16.mxu0 %v812_v31 }
  0x29   :  { %686 = vmatpush2.bf16.msra.mxu1 %v858_v48 }
  0x2a   :  { %687 = vmatprep.subr.bf16.mxu1 %v859_v53 }
  0x2b   :  { %241 = vmatpush2.bf16.msra.mxu0 %v814_v33 }
  0x2c   :  { %242 = vmatprep.subr.bf16.mxu0 %v815_v35 }
  0x2d   :  { %688 = vmatpush2.bf16.msra.mxu1 %v861_v54 }
  0x2e   :  { %689 = vmatprep.subr.bf16.mxu1 %v862_v55 }
  0x2f   :  { %243 = vmatpush2.bf16.msra.mxu0 %v817_v37 }
  0x30   :  { %244 = vmatprep.subr.bf16.mxu0 %v818_v39 }
  0x31   :  { %690 = vmatpush2.bf16.msra.mxu1 %v864_v56 }
  0x32   :  { %691 = vmatprep.subr.bf16.mxu1 %v865_v57 }
  0x33   :  { %245 = vmatpush2.bf16.msra.mxu0 %v820_v41 }
  0x34   :  { %246 = vmatprep.subr.bf16.mxu0 %v821_v43 }
  0x35   :  { %692 = vmatpush2.bf16.msra.mxu1 %v867_v58 }
  0x36   :  { %693 = vmatprep.subr.bf16.mxu1 %v868_v59 }
  0x37   :  { %247 = vmatpush2.bf16.msra.mxu0 %v823_v45 }
  0x38   :  { %248 = vmatprep.subr.bf16.mxu0 %v824_v47 }
  0x39   :  { %694 = vmatpush2.bf16.msra.mxu1 %v870_v60 }
  0x3a   :  { %695 = vmatprep.subr.bf16.mxu1 %v871_v61 }
  0x3b   :  { %249 = vmatpush2.bf16.msra.mxu0 %v826_v49 }
  0x3c   :  { %250 = vmatprep.subr.bf16.mxu0 %v827_v50 }
  0x3d   :  { %696 = vmatpush2.bf16.msra.mxu1 %v873_v62 }
  0x3e   :  { %697 = vmatprep.subr.bf16.mxu1 %v874_v63 }
  0x3f   :  { %251 = vmatpush2.bf16.msra.mxu0 %v829_v51 }
  0x41   :  { %698 = vmatpush2.bf16.msra.mxu1 %v876_v0 }
  0x42   :  { %253 = vmatmul.mubr.bf16.vlgmr.msra.gmra.mxu0 %v716_v52  ;;  %699 = vmatprep.subr.bf16.mxu1 %v877_v1 }
  0x45   :  { %700 = vmatpush2.bf16.msra.mxu1 %v879_v2 }
 0x102   :  { %v254_v10 = vpop.f32.mrf.mxu0 }
 0x103   :  { %v1146_v11 = vcombine.high %v254_v10, %v254_v10  ;;  %v1154_v13 = vmul.f32 %v1114_v3, %v254_v10  ;;  %v1157_v14 = vmul.f32 %v1119_v4, %v254_v10  ;;  %v1160_v15 = vmul.f32 %v1124_v5, %v254_v10 }
 0x104   :  { %v256_v16 = vpop.f32.mrf.mxu0  ;;  %v1163_v17 = vmul.f32 %v1129_v6, %v254_v10  ;;  %v356_v18 = vmul.f32 %v1134_v7, %v254_v10  ;;  %v357_v19 = vmul.f32 %v1139_v8, %v254_v10  ;;  %v358_v20 = vmul.f32 %v1144_v9, %v254_v10 }
 0x105   :  { %v1168_v21 = vcombine.high %v256_v16, %v256_v16  ;;  %v1171_v22 = vmul.f32 %v1134_v7, %v256_v16  ;;  %v1174_v23 = vmul.f32 %v1139_v8, %v256_v16  ;;  %v1177_v24 = vmul.f32 %v1144_v9, %v256_v16 }
 0x106   :  { %v258_v25 = vpop.f32.mrf.mxu0  ;;  %v1180_v26 = vmul.f32 %v1151_v12, %v256_v16  ;;  %v359_v27 = vmul.f32 %v1151_v12, %v254_v10  ;;  %v360_v28 = vmul.f32 %v1134_v7, %v1146_v11  ;;  %v361_v29 = vmul.f32 %v1139_v8, %v1146_v11 }
 0x107   :  { %v292_v30 = vsub.f32 %v1157_v14, %v1174_v23  ;;  %v293_v31 = vsub.f32 %v1160_v15, %v1177_v24  ;;  %v362_v32 = vmul.f32 %v1144_v9, %v1146_v11  ;;  %v363_v33 = vmul.f32 %v1151_v12, %v1146_v11 }
 0x108   :  { %v259_v34 = vpop.f32.mrf.mxu0  ;;  %v294_v35 = vsub.f32 %v1163_v17, %v1180_v26  ;;  %v364_v36 = vmul.f32 %v1114_v3, %v256_v16  ;;  %v365_v37 = vmul.f32 %v1119_v4, %v256_v16  ;;  %v366_v38 = vmul.f32 %v1124_v5, %v256_v16 }
 0x109   :  { %v367_v39 = vmul.f32 %v1129_v6, %v256_v16  ;;  %v368_v40 = vmul.f32 %v1114_v3, %v1168_v21  ;;  %v369_v41 = vmul.f32 %v1119_v4, %v1168_v21  ;;  %v370_v42 = vmul.f32 %v1124_v5, %v1168_v21 }
 0x10a   :  { %v371_v43 = vmul.f32 %v1129_v6, %v1168_v21  ;;  %v372_v44 = vadd.f32 %v364_v36, %v356_v18  ;;  %v373_v45 = vadd.f32 %v365_v37, %v357_v19  ;;  %v374_v46 = vadd.f32 %v366_v38, %v358_v20 }
 0x10b   :  { %v375_v47 = vadd.f32 %v367_v39, %v359_v27  ;;  %v376_v48 = vadd.f32 %v368_v40, %v360_v28  ;;  %v377_v49 = vadd.f32 %v369_v41, %v361_v29  ;;  %v378_v50 = vadd.f32 %v370_v42, %v362_v32 }
 0x10c   :  { %v379_v51 = vadd.f32 %v371_v43, %v363_v33  ;;  %v380_v52 = vsel %vm299_vm0, %v372_v44, 0.0  ;;  %v387_v53 = vsel %vm299_vm0, %v373_v45, 0.0  ;;  %v394_v54 = vsel %vm299_vm0, %v374_v46, 0.0 }
 0x10d   :  { %v381_v55 = vrot.slane %v380_v52, 4  ;;  %v388_v56 = vrot.slane %v387_v53, 4  ;;  %v395_v57 = vrot.slane %v394_v54, 4  ;;  %v401_v58 = vsel %vm299_vm0, %v375_v47, 0.0 }
 0x10e   :  { %v402_v59 = vrot.slane %v401_v58, 4  ;;  %v408_v60 = vsel %vm299_vm0, %v376_v48, 0.0  ;;  %v415_v61 = vsel %vm299_vm0, %v377_v49, 0.0  ;;  %v422_v62 = vsel %vm299_vm0, %v378_v50, 0.0 }
 0x10f   :  { %v382_v63 = vadd.f32 %v381_v55, %v380_v52  ;;  %v389_v0 = vadd.f32 %v388_v56, %v387_v53  ;;  %v396_v1 = vadd.f32 %v395_v57, %v394_v54  ;;  %v409_v2 = vrot.slane %v408_v60, 4 }
 0x110   :  { %v403_v10 = vadd.f32 %v402_v59, %v401_v58  ;;  %v416_v16 = vrot.slane %v415_v61, 4  ;;  %v423_v18 = vrot.slane %v422_v62, 4  ;;  %v429_v19 = vsel %vm299_vm0, %v379_v51, 0.0 }
 0x111   :  { %v383_v20 = vrot.slane %v382_v63, 2  ;;  %v390_v25 = vrot.slane %v389_v0, 2  ;;  %v397_v27 = vrot.slane %v396_v1, 2  ;;  %v410_v28 = vadd.f32 %v409_v2, %v408_v60 }
 0x112   :  { %v404_v29 = vrot.slane %v403_v10, 2  ;;  %v417_v32 = vadd.f32 %v416_v16, %v415_v61  ;;  %v424_v33 = vadd.f32 %v423_v18, %v422_v62  ;;  %v430_v34 = vrot.slane %v429_v19, 4 }
 0x113   :  { %v384_v36 = vadd.f32 %v383_v20, %v382_v63  ;;  %v391_v37 = vadd.f32 %v390_v25, %v389_v0  ;;  %v398_v38 = vadd.f32 %v397_v27, %v396_v1  ;;  %v411_v39 = vrot.slane %v410_v28, 2 }
 0x114   :  { %v405_v40 = vadd.f32 %v404_v29, %v403_v10  ;;  %v418_v41 = vrot.slane %v417_v32, 2  ;;  %v425_v42 = vrot.slane %v424_v33, 2  ;;  %v431_v43 = vadd.f32 %v430_v34, %v429_v19 }
 0x115   :  { %v385_v44 = vrot.slane %v384_v36, 1  ;;  %v392_v45 = vrot.slane %v391_v37, 1  ;;  %v399_v46 = vrot.slane %v398_v38, 1  ;;  %v412_v47 = vadd.f32 %v411_v39, %v410_v28 }
 0x116   :  { %v406_v48 = vrot.slane %v405_v40, 1  ;;  %v419_v49 = vadd.f32 %v418_v41, %v417_v32  ;;  %v426_v50 = vadd.f32 %v425_v42, %v424_v33  ;;  %v432_v51 = vrot.slane %v431_v43, 2 }
 0x117   :  { %v386_v52 = vadd.f32 %v385_v44, %v384_v36  ;;  %v393_v53 = vadd.f32 %v392_v45, %v391_v37  ;;  %v400_v54 = vadd.f32 %v399_v46, %v398_v38  ;;  %v413_v55 = vrot.slane %v412_v47, 1 }
 0x118   :  { %v407_v56 = vadd.f32 %v406_v48, %v405_v40  ;;  %v420_v57 = vrot.slane %v419_v49, 1  ;;  %v427_v58 = vrot.slane %v426_v50, 1  ;;  %v433_v59 = vadd.f32 %v432_v51, %v431_v43 }
 0x119   :  { %v414_v60 = vadd.f32 %v413_v55, %v412_v47  ;;  %v467_v61 = vsel %vm444_vm1, %v393_v53, %v386_v52  ;;  %v279_v62 = vmul.f32 %v1114_v3, %v1146_v11  ;;  %v280_v63 = vmul.f32 %v1119_v4, %v1146_v11 }
 0x11a   :  { %v421_v0 = vadd.f32 %v420_v57, %v419_v49  ;;  %v428_v1 = vadd.f32 %v427_v58, %v426_v50  ;;  %v434_v2 = vrot.slane %v433_v59, 1  ;;  %v468_v10 = vsel %vm446_vm2, %v400_v54, %v467_v61 }
 0x11b   :  { %v469_v16 = vsel %vm448_vm3, %v407_v56, %v468_v10  ;;  %v281_v18 = vmul.f32 %v1124_v5, %v1146_v11  ;;  %v282_v19 = vmul.f32 %v1129_v6, %v1146_v11  ;;  %v287_v20 = vmul.f32 %v1134_v7, %v1168_v21 }
 0x11c   :  { %v435_v3 = vadd.f32 %v434_v2, %v433_v59  ;;  %v470_v25 = vsel %vm450_vm4, %v414_v60, %v469_v16  ;;  %v288_v4 = vmul.f32 %v1139_v8, %v1168_v21  ;;  %v289_v27 = vmul.f32 %v1144_v9, %v1168_v21 }
 0x11d   :  { %v471_v28 = vsel %vm452_vm5, %v421_v0, %v470_v25  ;;  %v290_v5 = vmul.f32 %v1151_v12, %v1168_v21  ;;  %v291_v6 = vsub.f32 %v1154_v13, %v1171_v22  ;;  %v295_v11 = vsub.f32 %v279_v62, %v287_v20 }
 0x11e   :  { %v472_v7 = vsel %vm454_vm6, %v428_v1, %v471_v28  ;;  %v296_v29 = vsub.f32 %v280_v63, %v288_v4  ;;  %v297_v32 = vsub.f32 %v281_v18, %v289_v27  ;;  %v307_v8 = vsel %vm299_vm0, %v292_v30, 0.0 }
 0x11f   :  { %v473_v9 = vsel %vm456_vm7, %v435_v3, %v472_v7  ;;  %v298_v33 = vsub.f32 %v282_v19, %v290_v5  ;;  %v300_v34 = vsel %vm299_vm0, %v291_v6, 0.0  ;;  %v308_v36 = vrot.slane %v307_v8, 4 }
 0x120   :  { %v476_v12 = vpack.c.bf16 %v473_v9, %v473_v9  ;;  %v301_v21 = vrot.slane %v300_v34, 4  ;;  %v314_v13 = vsel %vm299_vm0, %v293_v31, 0.0  ;;  %v321_v14 = vsel %vm299_vm0, %v294_v35, 0.0 }
 0x121   :  { %v309_v22 = vadd.f32 %v308_v36, %v307_v8  ;;  %v315_v23 = vrot.slane %v314_v13, 4  ;;  %v322_v30 = vrot.slane %v321_v14, 4  ;;  %v328_v37 = vsel %vm299_vm0, %v295_v11, 0.0 }
 0x122   :  { %701 = vmatprep.mubr.bf16.mxu1 %v476_v12  ;;  %v302_v38 = vadd.f32 %v301_v21, %v300_v34  ;;  %v329_v39 = vrot.slane %v328_v37, 4  ;;  %v335_v40 = vsel %vm299_vm0, %v296_v29, 0.0  ;;  %v342_v41 = vsel %vm299_vm0, %v297_v32, 0.0 }
 0x123   :  { %v310_v15 = vrot.slane %v309_v22, 2  ;;  %v316_v24 = vadd.f32 %v315_v23, %v314_v13  ;;  %v323_v31 = vadd.f32 %v322_v30, %v321_v14  ;;  %v336_v42 = vrot.slane %v335_v40, 4 }
 0x124   :  { %v303_v43 = vrot.slane %v302_v38, 2  ;;  %v330_v17 = vadd.f32 %v329_v39, %v328_v37  ;;  %v343_v26 = vrot.slane %v342_v41, 4  ;;  %v349_v35 = vsel %vm299_vm0, %v298_v33, 0.0 }
 0x125   :  { %v311_v44 = vadd.f32 %v310_v15, %v309_v22  ;;  %v317_v45 = vrot.slane %v316_v24, 2  ;;  %v324_v46 = vrot.slane %v323_v31, 2  ;;  %v337_v47 = vadd.f32 %v336_v42, %v335_v40 }
 0x126   :  { %v304_v48 = vadd.f32 %v303_v43, %v302_v38  ;;  %v331_v49 = vrot.slane %v330_v17, 2  ;;  %v344_v50 = vadd.f32 %v343_v26, %v342_v41  ;;  %v350_v51 = vrot.slane %v349_v35, 4 }
 0x127   :  { %v312_v52 = vrot.slane %v311_v44, 1  ;;  %v318_v53 = vadd.f32 %v317_v45, %v316_v24  ;;  %v325_v54 = vadd.f32 %v324_v46, %v323_v31  ;;  %v338_v55 = vrot.slane %v337_v47, 2 }
 0x128   :  { %v305_v56 = vrot.slane %v304_v48, 1  ;;  %v332_v57 = vadd.f32 %v331_v49, %v330_v17  ;;  %v345_v58 = vrot.slane %v344_v50, 2  ;;  %v351_v59 = vadd.f32 %v350_v51, %v349_v35 }
 0x129   :  { %v313_v60 = vadd.f32 %v312_v52, %v311_v44  ;;  %v319_v61 = vrot.slane %v318_v53, 1  ;;  %v326_v62 = vrot.slane %v325_v54, 1  ;;  %v339_v63 = vadd.f32 %v338_v55, %v337_v47 }
 0x12a   :  { %v306_v0 = vadd.f32 %v305_v56, %v304_v48  ;;  %v333_v1 = vrot.slane %v332_v57, 1  ;;  %v346_v2 = vadd.f32 %v345_v58, %v344_v50  ;;  %v352_v10 = vrot.slane %v351_v59, 2 }
 0x12b   :  { %v320_v16 = vadd.f32 %v319_v61, %v318_v53  ;;  %v327_v18 = vadd.f32 %v326_v62, %v325_v54  ;;  %v340_v19 = vrot.slane %v339_v63, 1 }
 0x12c   :  { %v334_v20 = vadd.f32 %v333_v1, %v332_v57  ;;  %v347_v3 = vrot.slane %v346_v2, 1  ;;  %v353_v25 = vadd.f32 %v352_v10, %v351_v59  ;;  %v445_v4 = vsel %vm444_vm1, %v313_v60, %v306_v0 }
 0x12d   :  { %v447_v27 = vsel %vm446_vm2, %v320_v16, %v445_v4  ;;  %v341_v28 = vadd.f32 %v340_v19, %v339_v63 }
 0x12e   :  { %v354_v5 = vrot.slane %v353_v25, 1  ;;  %v449_v6 = vsel %vm448_vm3, %v327_v18, %v447_v27  ;;  %v348_v11 = vadd.f32 %v347_v3, %v346_v2 }
 0x12f   :  { %v451_v7 = vsel %vm450_vm4, %v334_v20, %v449_v6 }
 0x130   :  { %v355_v29 = vadd.f32 %v354_v5, %v353_v25  ;;  %v453_v32 = vsel %vm452_vm5, %v341_v28, %v451_v7 }
 0x131   :  { %v455_v8 = vsel %vm454_vm6, %v348_v11, %v453_v32 }
 0x132   :  { %v457_v9 = vsel %vm456_vm7, %v355_v29, %v455_v8 }
 0x133   :  { %v475_v33 = vpack.c.bf16 %v457_v9, %v457_v9 }
 0x135   :  { %702 = vmatmul.mubr.bf16.vlgmr.msra.gmra.mxu1 %v475_v33 }
 0x1f5   :  { %v703_v34 = vpop.f32.mrf.mxu1 }
 0x1f6   :  { %710 = vst [vmem:[%s1277_s5] sm:$0xff] %v703_v34 }
 0x1f7   :  { %v705_v36 = vpop.f32.mrf.mxu1 }
 0x1f8   :  { %711 = vst [vmem:[%s1277_s5 + $0x8] sm:$0xff] %v705_v36 }
 0x1f9   :  { %v707_v12 = vpop.f32.mrf.mxu1 }
 0x1fb   :  { %v708_v21 = vpop.f32.mrf.mxu1 }

</bundles_post_ra>
